<compile_context>
chip_gen: v7x
topology: tpu7x:2x2x1
jax: 0.10.0
libtpu: 0.0.40
codegen_flags: <defaults>
</compile_context>

<pallas_src>
import functools

import jax
import jax.numpy as jnp
from jax.experimental import pallas as pl
from jax.experimental.pallas import tpu as pltpu


def _round_up(x, m):
    return (x + m - 1) // m * m


def _corr_kernel(o_ref, t_ref, corr_ref,
                 s_o, s_t, s_oo, s_tt, s_ot, *, eps, n_actual):
    # o_ref / t_ref: (tile_n, tile_d) VMEM tiles; corr_ref: (1, tile_d).
    # Grid = (D_blocks, N_blocks); axis 1 (N) is the reduction axis.
    ni = pl.program_id(1)

    @pl.when(ni == 0)
    def _():
        s_o[...] = jnp.zeros_like(s_o)
        s_t[...] = jnp.zeros_like(s_t)
        s_oo[...] = jnp.zeros_like(s_oo)
        s_tt[...] = jnp.zeros_like(s_tt)
        s_ot[...] = jnp.zeros_like(s_ot)

    o = o_ref[...].astype(jnp.float32)
    t = t_ref[...].astype(jnp.float32)

    # Single pass: raw-moment accumulation in f32.
    # TODO(synk): if inputs can have |mean| >> std, switch to a two-pass
    # (means first, then centered sums) variant to avoid f32 cancellation.
    s_o[...] += jnp.sum(o, axis=0, keepdims=True)
    s_t[...] += jnp.sum(t, axis=0, keepdims=True)
    s_oo[...] += jnp.sum(o * o, axis=0, keepdims=True)
    s_tt[...] += jnp.sum(t * t, axis=0, keepdims=True)
    s_ot[...] += jnp.sum(o * t, axis=0, keepdims=True)

    @pl.when(ni == pl.num_programs(1) - 1)
    def _():
        inv_n = jnp.float32(1.0 / n_actual)
        mean_o = s_o[...] * inv_n
        mean_t = s_t[...] * inv_n
        var_o = jnp.maximum(s_oo[...] * inv_n - mean_o * mean_o, 0.0)
        var_t = jnp.maximum(s_tt[...] * inv_n - mean_t * mean_t, 0.0)
        cov = s_ot[...] * inv_n - mean_o * mean_t
        denom_sq = (var_o + eps) * (var_t + eps)
        corr_ref[...] = (cov * jax.lax.rsqrt(denom_sq)).astype(corr_ref.dtype)


def corr(output, target, *, eps=1e-12, vmem_budget_bytes=40 * 1024 * 1024):
    """Pallas implementation of Corr.forward. output/target: (N, D) -> (1, D)."""
    assert output.shape == target.shape and output.ndim == 2
    n, d = output.shape
    itemsize = jnp.dtype(output.dtype).itemsize

    n_pad8 = _round_up(n, 8)
    d_pad128 = _round_up(d, 128)

    # ---- tile selection (bandwidth bound: big lane-dense tiles) ----
    tile_d = min(d_pad128, 2048)
    if d_pad128 // tile_d < 2 and d_pad128 >= 256:
        # keep >= 2 feature blocks so the "parallel" axis can shard across
        # the two TensorCores on v7x
        tile_d = max(128, (d_pad128 // 2) // 128 * 128)
    per_row_bytes = 2 * 2 * tile_d * itemsize  # 2 inputs x 2 pipeline buffers
    tile_n = min(n_pad8, max(8, (vmem_budget_bytes // per_row_bytes) // 8 * 8))

    n_pad = _round_up(n, tile_n)
    d_pad = _round_up(d, tile_d)

    # Zero padding is exact here: padded rows/cols add nothing to the sums and
    # we divide by the true batch size n; padded columns are sliced off below.
    if (n_pad, d_pad) != (n, d):
        pad = ((0, n_pad - n), (0, d_pad - d))
        output_p = jnp.pad(output, pad)
        target_p = jnp.pad(target, pad)
    else:
        output_p, target_p = output, target

    grid = (d_pad // tile_d, n_pad // tile_n)  # reduction (N) axis last

    vmem_bytes = (2 * 2 * tile_n * tile_d * itemsize   # double-buffered inputs
                  + 2 * 8 * tile_d * itemsize          # double-buffered out tile
                  + 5 * 8 * tile_d * 4)                # accumulator scratch
    vmem_limit = int(vmem_bytes * 1.25) + (2 << 20)

    kernel = functools.partial(_corr_kernel, eps=float(eps), n_actual=n)

    out = pl.pallas_call(
        kernel,
        out_shape=jax.ShapeDtypeStruct((1, d_pad), output.dtype),
        grid_spec=pltpu.PrefetchScalarGridSpec(
            num_scalar_prefetch=0,
            grid=grid,
            in_specs=[
                pl.BlockSpec((tile_n, tile_d), lambda j, i: (i, j)),
                pl.BlockSpec((tile_n, tile_d), lambda j, i: (i, j)),
            ],
            out_specs=pl.BlockSpec((1, tile_d), lambda j, i: (0, j)),
            scratch_shapes=[pltpu.VMEM((1, tile_d), jnp.float32)
                            for _ in range(5)],
        ),
        compiler_params=pltpu.CompilerParams(
            dimension_semantics=("parallel", "arbitrary"),
            vmem_limit_bytes=vmem_limit,
        ),
    )(output_p, target_p)

    return out[:, :d]


def corr_ref_jax(output, target, eps=1e-12):
    """Pure-JAX reference mirroring the PyTorch module."""
    delta_o = output - output.mean(0, keepdims=True)
    delta_t = target - target.mean(0, keepdims=True)
    var_o = (delta_o ** 2).mean(0, keepdims=True)
    var_t = (delta_t ** 2).mean(0, keepdims=True)
    return (delta_o * delta_t).mean(0, keepdims=True) / jnp.sqrt(
        (var_o + eps) * (var_t + eps)
    )


if __name__ == "__main__":
    key = jax.random.PRNGKey(0)
    k1, k2 = jax.random.split(key)

    # small shapes; deliberately not multiples of 8 / 128 to exercise padding
    N, D = 10, 300  # (batch, neurons)
    output = jax.random.normal(k1, (N, D), dtype=jnp.float32)
    # make target correlated with output so the result is non-trivial
    target = 0.5 * output + 0.5 * jax.random.normal(k2, (N, D), dtype=jnp.float32)

    corrs = corr(output, target)
    jax.block_until_ready(corrs)

    ref = corr_ref_jax(output, target)
    assert corrs.shape == (1, D)
    assert jnp.allclose(corrs, ref, atol=1e-4, rtol=1e-4), float(
        jnp.max(jnp.abs(corrs - ref))
    )

    print("KERNEL_OK")
</pallas_src>

<mosaic_0001>
module attributes {stable_mosaic.version = 11 : i64} {
  func.func @_corr_kernel(%arg0: i32, %arg1: i32, %arg2: memref<16x128xf32, #tpu.memory_space<vmem>>, %arg3: memref<16x128xf32, #tpu.memory_space<vmem>>, %arg4: memref<1x128xf32, #tpu.memory_space<vmem>>, %arg5: memref<1x128xf32, #tpu.memory_space<vmem>>, %arg6: memref<1x128xf32, #tpu.memory_space<vmem>>, %arg7: memref<1x128xf32, #tpu.memory_space<vmem>>, %arg8: memref<1x128xf32, #tpu.memory_space<vmem>>, %arg9: memref<1x128xf32, #tpu.memory_space<vmem>>) attributes {dimension_semantics = [#tpu.dimension_semantics<parallel>, #tpu.dimension_semantics<arbitrary>], iteration_bounds = array<i64: 3, 1>, scalar_prefetch = 0 : i64, scratch_operands = 5 : i64, tpu.core_type = #tpu.core_type<tc>, window_params = [{transform_indices = @transform_0, window_bounds = array<i64: 16, 128>}, {transform_indices = @transform_1, window_bounds = array<i64: 16, 128>}, {transform_indices = @transform_2, window_bounds = array<i64: 1, 128>}]} {
    %c0_i32 = arith.constant 0 : i32
    %0 = arith.cmpi eq, %arg1, %c0_i32 : i32
    %1 = arith.extui %0 : i1 to i32
    %c0_i32_0 = arith.constant 0 : i32
    %2 = arith.cmpi ne, %1, %c0_i32_0 : i32
    scf.if %2 {
      %cst_30 = arith.constant 0.000000e+00 : f32
      %36 = vector.broadcast %cst_30 : f32 to vector<1x128xf32>
      %c0_31 = arith.constant 0 : index
      %c0_32 = arith.constant 0 : index
      %37 = vector.load %arg5[%c0_31, %c0_32] : memref<1x128xf32, #tpu.memory_space<vmem>>, vector<1x128xf32>
      tpu.vector_store %arg5[%c0_31, %c0_32], %36 {strides = array<i32>} : memref<1x128xf32, #tpu.memory_space<vmem>>, vector<1x128xf32>,
      %cst_33 = arith.constant 0.000000e+00 : f32
      %38 = vector.broadcast %cst_33 : f32 to vector<1x128xf32>
      %c0_34 = arith.constant 0 : index
      %c0_35 = arith.constant 0 : index
      %39 = vector.load %arg6[%c0_34, %c0_35] : memref<1x128xf32, #tpu.memory_space<vmem>>, vector<1x128xf32>
      tpu.vector_store %arg6[%c0_34, %c0_35], %38 {strides = array<i32>} : memref<1x128xf32, #tpu.memory_space<vmem>>, vector<1x128xf32>,
      %cst_36 = arith.constant 0.000000e+00 : f32
      %40 = vector.broadcast %cst_36 : f32 to vector<1x128xf32>
      %c0_37 = arith.constant 0 : index
      %c0_38 = arith.constant 0 : index
      %41 = vector.load %arg7[%c0_37, %c0_38] : memref<1x128xf32, #tpu.memory_space<vmem>>, vector<1x128xf32>
      tpu.vector_store %arg7[%c0_37, %c0_38], %40 {strides = array<i32>} : memref<1x128xf32, #tpu.memory_space<vmem>>, vector<1x128xf32>,
      %cst_39 = arith.constant 0.000000e+00 : f32
      %42 = vector.broadcast %cst_39 : f32 to vector<1x128xf32>
      %c0_40 = arith.constant 0 : index
      %c0_41 = arith.constant 0 : index
      %43 = vector.load %arg8[%c0_40, %c0_41] : memref<1x128xf32, #tpu.memory_space<vmem>>, vector<1x128xf32>
      tpu.vector_store %arg8[%c0_40, %c0_41], %42 {strides = array<i32>} : memref<1x128xf32, #tpu.memory_space<vmem>>, vector<1x128xf32>,
      %cst_42 = arith.constant 0.000000e+00 : f32
      %44 = vector.broadcast %cst_42 : f32 to vector<1x128xf32>
      %c0_43 = arith.constant 0 : index
      %c0_44 = arith.constant 0 : index
      %45 = vector.load %arg9[%c0_43, %c0_44] : memref<1x128xf32, #tpu.memory_space<vmem>>, vector<1x128xf32>
      tpu.vector_store %arg9[%c0_43, %c0_44], %44 {strides = array<i32>} : memref<1x128xf32, #tpu.memory_space<vmem>>, vector<1x128xf32>,
    } else {
    }
    %c0 = arith.constant 0 : index
    %c0_1 = arith.constant 0 : index
    %3 = vector.load %arg2[%c0, %c0_1] : memref<16x128xf32, #tpu.memory_space<vmem>>, vector<16x128xf32>
    %c0_2 = arith.constant 0 : index
    %c0_3 = arith.constant 0 : index
    %4 = vector.load %arg3[%c0_2, %c0_3] : memref<16x128xf32, #tpu.memory_space<vmem>>, vector<16x128xf32>
    %c0_4 = arith.constant 0 : index
    %c0_5 = arith.constant 0 : index
    %5 = vector.load %arg5[%c0_4, %c0_5] : memref<1x128xf32, #tpu.memory_space<vmem>>, vector<1x128xf32>
    %cst = arith.constant dense<0.000000e+00> : vector<128xf32>
    %6 = vector.multi_reduction <add>, %3, %cst [0] : vector<16x128xf32> to vector<128xf32>
    %7 = vector.shape_cast %6 : vector<128xf32> to vector<1x128xf32>
    %8 = arith.addf %5, %7 : vector<1x128xf32>
    %c0_6 = arith.constant 0 : index
    %c0_7 = arith.constant 0 : index
    %9 = vector.load %arg5[%c0_6, %c0_7] : memref<1x128xf32, #tpu.memory_space<vmem>>, vector<1x128xf32>
    tpu.vector_store %arg5[%c0_6, %c0_7], %8 {strides = array<i32>} : memref<1x128xf32, #tpu.memory_space<vmem>>, vector<1x128xf32>,
    %c0_8 = arith.constant 0 : index
    %c0_9 = arith.constant 0 : index
    %10 = vector.load %arg6[%c0_8, %c0_9] : memref<1x128xf32, #tpu.memory_space<vmem>>, vector<1x128xf32>
    %cst_10 = arith.constant dense<0.000000e+00> : vector<128xf32>
    %11 = vector.multi_reduction <add>, %4, %cst_10 [0] : vector<16x128xf32> to vector<128xf32>
    %12 = vector.shape_cast %11 : vector<128xf32> to vector<1x128xf32>
    %13 = arith.addf %10, %12 : vector<1x128xf32>
    %c0_11 = arith.constant 0 : index
    %c0_12 = arith.constant 0 : index
    %14 = vector.load %arg6[%c0_11, %c0_12] : memref<1x128xf32, #tpu.memory_space<vmem>>, vector<1x128xf32>
    tpu.vector_store %arg6[%c0_11, %c0_12], %13 {strides = array<i32>} : memref<1x128xf32, #tpu.memory_space<vmem>>, vector<1x128xf32>,
    %c0_13 = arith.constant 0 : index
    %c0_14 = arith.constant 0 : index
    %15 = vector.load %arg7[%c0_13, %c0_14] : memref<1x128xf32, #tpu.memory_space<vmem>>, vector<1x128xf32>
    %16 = arith.mulf %3, %3 : vector<16x128xf32>
    %cst_15 = arith.constant dense<0.000000e+00> : vector<128xf32>
    %17 = vector.multi_reduction <add>, %16, %cst_15 [0] : vector<16x128xf32> to vector<128xf32>
    %18 = vector.shape_cast %17 : vector<128xf32> to vector<1x128xf32>
    %19 = arith.addf %15, %18 : vector<1x128xf32>
    %c0_16 = arith.constant 0 : index
    %c0_17 = arith.constant 0 : index
    %20 = vector.load %arg7[%c0_16, %c0_17] : memref<1x128xf32, #tpu.memory_space<vmem>>, vector<1x128xf32>
    tpu.vector_store %arg7[%c0_16, %c0_17], %19 {strides = array<i32>} : memref<1x128xf32, #tpu.memory_space<vmem>>, vector<1x128xf32>,
    %c0_18 = arith.constant 0 : index
    %c0_19 = arith.constant 0 : index
    %21 = vector.load %arg8[%c0_18, %c0_19] : memref<1x128xf32, #tpu.memory_space<vmem>>, vector<1x128xf32>
    %22 = arith.mulf %4, %4 : vector<16x128xf32>
    %cst_20 = arith.constant dense<0.000000e+00> : vector<128xf32>
    %23 = vector.multi_reduction <add>, %22, %cst_20 [0] : vector<16x128xf32> to vector<128xf32>
    %24 = vector.shape_cast %23 : vector<128xf32> to vector<1x128xf32>
    %25 = arith.addf %21, %24 : vector<1x128xf32>
    %c0_21 = arith.constant 0 : index
    %c0_22 = arith.constant 0 : index
    %26 = vector.load %arg8[%c0_21, %c0_22] : memref<1x128xf32, #tpu.memory_space<vmem>>, vector<1x128xf32>
    tpu.vector_store %arg8[%c0_21, %c0_22], %25 {strides = array<i32>} : memref<1x128xf32, #tpu.memory_space<vmem>>, vector<1x128xf32>,
    %c0_23 = arith.constant 0 : index
    %c0_24 = arith.constant 0 : index
    %27 = vector.load %arg9[%c0_23, %c0_24] : memref<1x128xf32, #tpu.memory_space<vmem>>, vector<1x128xf32>
    %28 = arith.mulf %3, %4 : vector<16x128xf32>
    %cst_25 = arith.constant dense<0.000000e+00> : vector<128xf32>
    %29 = vector.multi_reduction <add>, %28, %cst_25 [0] : vector<16x128xf32> to vector<128xf32>
    %30 = vector.shape_cast %29 : vector<128xf32> to vector<1x128xf32>
    %31 = arith.addf %27, %30 : vector<1x128xf32>
    %c0_26 = arith.constant 0 : index
    %c0_27 = arith.constant 0 : index
    %32 = vector.load %arg9[%c0_26, %c0_27] : memref<1x128xf32, #tpu.memory_space<vmem>>, vector<1x128xf32>
    tpu.vector_store %arg9[%c0_26, %c0_27], %31 {strides = array<i32>} : memref<1x128xf32, #tpu.memory_space<vmem>>, vector<1x128xf32>,
    %c0_i32_28 = arith.constant 0 : i32
    %33 = arith.cmpi eq, %arg1, %c0_i32_28 : i32
    %34 = arith.extui %33 : i1 to i32
    %c0_i32_29 = arith.constant 0 : i32
    %35 = arith.cmpi ne, %34, %c0_i32_29 : i32
    scf.if %35 {
      %c0_30 = arith.constant 0 : index
      %c0_31 = arith.constant 0 : index
      %36 = vector.load %arg5[%c0_30, %c0_31] : memref<1x128xf32, #tpu.memory_space<vmem>>, vector<1x128xf32>
      %cst_32 = arith.constant 1.000000e-01 : f32
      %37 = vector.broadcast %cst_32 : f32 to vector<1x128xf32>
      %38 = arith.mulf %36, %37 : vector<1x128xf32>
      %c0_33 = arith.constant 0 : index
      %c0_34 = arith.constant 0 : index
      %39 = vector.load %arg6[%c0_33, %c0_34] : memref<1x128xf32, #tpu.memory_space<vmem>>, vector<1x128xf32>
      %cst_35 = arith.constant 1.000000e-01 : f32
      %40 = vector.broadcast %cst_35 : f32 to vector<1x128xf32>
      %41 = arith.mulf %39, %40 : vector<1x128xf32>
      %c0_36 = arith.constant 0 : index
      %c0_37 = arith.constant 0 : index
      %42 = vector.load %arg7[%c0_36, %c0_37] : memref<1x128xf32, #tpu.memory_space<vmem>>, vector<1x128xf32>
      %cst_38 = arith.constant 1.000000e-01 : f32
      %43 = vector.broadcast %cst_38 : f32 to vector<1x128xf32>
      %44 = arith.mulf %42, %43 : vector<1x128xf32>
      %45 = arith.mulf %38, %38 : vector<1x128xf32>
      %46 = arith.subf %44, %45 : vector<1x128xf32>
      %cst_39 = arith.constant 0.000000e+00 : f32
      %47 = vector.broadcast %cst_39 : f32 to vector<1x128xf32>
      %48 = arith.maximumf %46, %47 : vector<1x128xf32>
      %c0_40 = arith.constant 0 : index
      %c0_41 = arith.constant 0 : index
      %49 = vector.load %arg8[%c0_40, %c0_41] : memref<1x128xf32, #tpu.memory_space<vmem>>, vector<1x128xf32>
      %cst_42 = arith.constant 1.000000e-01 : f32
      %50 = vector.broadcast %cst_42 : f32 to vector<1x128xf32>
      %51 = arith.mulf %49, %50 : vector<1x128xf32>
      %52 = arith.mulf %41, %41 : vector<1x128xf32>
      %53 = arith.subf %51, %52 : vector<1x128xf32>
      %cst_43 = arith.constant 0.000000e+00 : f32
      %54 = vector.broadcast %cst_43 : f32 to vector<1x128xf32>
      %55 = arith.maximumf %53, %54 : vector<1x128xf32>
      %c0_44 = arith.constant 0 : index
      %c0_45 = arith.constant 0 : index
      %56 = vector.load %arg9[%c0_44, %c0_45] : memref<1x128xf32, #tpu.memory_space<vmem>>, vector<1x128xf32>
      %cst_46 = arith.constant 1.000000e-01 : f32
      %57 = vector.broadcast %cst_46 : f32 to vector<1x128xf32>
      %58 = arith.mulf %56, %57 : vector<1x128xf32>
      %59 = arith.mulf %38, %41 : vector<1x128xf32>
      %60 = arith.subf %58, %59 : vector<1x128xf32>
      %cst_47 = arith.constant 9.99999996E-13 : f32
      %61 = vector.broadcast %cst_47 : f32 to vector<1x128xf32>
      %62 = arith.addf %48, %61 : vector<1x128xf32>
      %cst_48 = arith.constant 9.99999996E-13 : f32
      %63 = vector.broadcast %cst_48 : f32 to vector<1x128xf32>
      %64 = arith.addf %55, %63 : vector<1x128xf32>
      %65 = arith.mulf %62, %64 : vector<1x128xf32>
      %66 = math.rsqrt %65 : vector<1x128xf32>
      %67 = arith.mulf %60, %66 : vector<1x128xf32>
      %c0_49 = arith.constant 0 : index
      %c0_50 = arith.constant 0 : index
      %68 = vector.load %arg4[%c0_49, %c0_50] : memref<1x128xf32, #tpu.memory_space<vmem>>, vector<1x128xf32>
      tpu.vector_store %arg4[%c0_49, %c0_50], %67 {strides = array<i32>} : memref<1x128xf32, #tpu.memory_space<vmem>>, vector<1x128xf32>,
    } else {
    }
    return
  }
  func.func @transform_0(%arg0: i32, %arg1: i32) -> (i32, i32) {
    %c0_i32 = arith.constant 0 : i32
    return %arg1, %arg0 : i32, i32
  }
  func.func @transform_1(%arg0: i32, %arg1: i32) -> (i32, i32) {
    %c0_i32 = arith.constant 0 : i32
    return %arg1, %arg0 : i32, i32
  }
  func.func @transform_2(%arg0: i32, %arg1: i32) -> (i32, i32) {
    %c0_i32 = arith.constant 0 : i32
    %c0_i32_0 = arith.constant 0 : i32
    return %c0_i32, %arg0 : i32, i32
  }
}

</mosaic_0001>

<bundles_post_ra>
// kernel: tpu_custom_call.1
= control target key start
LH: loop header
LB: loop body
LE: loop exit
PB: predicated region body
PF: predicated region fallthrough
CT: control target
= control target key end

     0   :  { %7 = vsyncpa [#allocation8], 0  ;;  %s921_s0 = inlined_call_operand.hbm [shape: f32[16,384], index: 0, kind: input, shape index: {}]   ;;  %s922_s1 = inlined_call_operand.hbm [shape: f32[16,384], index: 1, kind: input, shape index: {}]   ;;  %s923_s2 = inlined_call_operand.hbm [shape: f32[1,384], index: 2, kind: output, shape index: {}]  }
   0x1   :  { %9 = vsyncpa [#allocation8 + $0x1], 0 }
   0x2   :  { %10 = vsyncpa [#allocation11], 0 }
   0x3   :  { %12 = vsyncpa [#allocation11 + $0x1], 0 }
   0x4   :  { %13 = vsyncpa [#allocation9], 0 }
   0x5   :  { %15 = vsyncpa [#allocation9 + $0x1], 0  ;;  %s690_s9 = smov 0   ;;  %s692_s10 = smov 0  }
   0x6   :  { %s694_s11 = smov 0   ;;  %s696_s12 = smov 0  }
   0x7   :  { %s698_s13 = smov 0   ;;  %s700_s14 = smov 0  }
   0x8 LB: > { %s433_s15 = sadd.s32 4294967295, %s666_s14   ;;  %s434_s16 = sadd.s32 4294967294, %s666_s14   ;;  %s666_s14 = sphi %s700_s14, %s21_s14   ;;  %s662_s13 = sphi %s698_s13, %s939_s13   ;;  %s658_s12 = sphi %s696_s12, %s938_s12   ;;  %s654_s11 = sphi %s694_s11, %s937_s11   ;;  %s650_s10 = sphi %s692_s10, %s936_s10   ;;  %s646_s9 = sphi %s690_s9, %s935_s9  }
   0x9   : > { %s33_s17 = sadd.s32 1, %s662_s13  ;;  %s42_s18 = sadd.s32 1, %s654_s11 }
   0xa   : > { %p35_p0 = scmp.ge.s32.totalorder %s33_s17, 3  ;;  %p49_p1 = scmp.ne.s32.totalorder %s654_s11, %s650_s10 }
   0xb   : > { %p50_p2 = scmp.eq.s32.totalorder %s666_s14, 0  ;;  %p55_p3 = scmp.ne.s32.totalorder %s650_s10, %s646_s9 }
   0xc   : > { %s941_s17 = smov (%p35_p0, %s33_s17), 0  ;;  %p56_p5 = scmp.eq.s32.totalorder %s433_s15, 0 }
   0xd   : > { %p731_p4 = por %p50_p2, %p49_p1  ;;  %s38_s20 = ssub.s32 %s662_s13, %s941_s17 }
   0xe   : > { %p107_p6 = scmp.eq.s32.totalorder %s433_s15, 2  ;;  %p40_p7 = scmp.eq.s32.totalorder %s38_s20, 0 }
   0xf   : > { %p737_p8 = por %p56_p5, %p55_p3  ;;  %p113_p10 = scmp.eq.s32.totalorder %s434_s16, 2 }
  0x10   : > { %p741_p9 = por %p107_p6, %p49_p1  ;;  %p464_p12 = scmp.lt.s32.totalorder %s666_s14, 3 }
  0x11   : > { %s927_s21 = scalar_select %p737_p8, 1, 0 }
  0x12   : > { %s928_s22 = scalar_select %p741_p9, 1, 0 }
  0x13   : > { %s746_s23 = scalar_select %p40_p7, %s654_s11, %s42_s18  }
  0x14   : > { %p748_p11 = por %p113_p10, %p55_p3  ;;  %s754_s25 = sand.u32 1, %s654_s11  }
  0x15   : > { %s437_s26 = sshll.u32 %s754_s25, 4  ;;  %s438_s27 = sshll.u32 %s662_s13, 7 }
  0x16   : > { %s929_s24 = scalar_select %p748_p11, 1, 0 }
  0x17   : > { %s763_s30 = scalar_lea.hbm %s921_s0, %s438_s27  ;;  %s137_s3 = scalar_lea.vmem [#allocation7], %s437_s26 }
  0x18   : > { %s146_s4 = sshll.u32 %s137_s3, 4  ;;  %p771_p13 = pnand %p464_p12, %p731_p4  ;;  %s767_s4 = int_to_ptr.vmem [resolvable:$true] %s146_s4 }
  0x19   : > { %s134_s6 = scalar_lea.sflag [#allocation8], %s754_s25  ;;  %s520_s7 = scalar_lea.hbm %s763_s30, 256 }
  0x1a   : > { %p521_p0 = scmp.ne.s32.totalorder %s763_s30, %s520_s7  ;;  %p522_p1 = pneg %p771_p13 }
  0x1b   : > { %s525_s16 = scalar_lea.hbm %s921_s0, 768  ;;  %p526_p4 = scmp.lt.u32.totalorder %s763_s30, %s921_s0 }
  0x1c   : > { %p523_p2 = pnand %p522_p1, %p521_p0  ;;  %p527_p5 = scmp.lt.u32.totalorder %s525_s16, %s520_s7 }
  0x1d   : > { %p529_p7 = scmp.lt.u32.totalorder %s520_s7, %s763_s30 }
  0x1e   : > { %p524_p3 = pneg %p523_p2  ;;  %p528_p6 = por %p527_p5, %p526_p4 }
  0x20   : > { %p530_p10 = por %p529_p7, %p528_p6 }
  0x22   : > { %p531_p12 = pnand %p530_p10, %p524_p3 }
  0x24   : > { %534 = shalt.err (!%p531_p12)
}
  0x25   : > { %s535_s20 = scalar_lea.vmem %s767_s4, 256  ;;  %s668_s28 = smov [#allocation7]  }
  0x26   : > { %p536_p0 = scmp.ne.s32.totalorder %s767_s4, %s535_s20  ;;  %s540_s29 = sshll.u32 %s668_s28, 4  ;;  %s541_s29 = int_to_ptr.vmem [resolvable:$false] %s540_s29 }
  0x27   : > { %s542_s3 = scalar_lea.vmem %s541_s29, 512  ;;  %p543_p9 = scmp.lt.s32.totalorder %s767_s4, %s541_s29 }
  0x28   : > { %p538_p2 = pnand %p536_p0, %p522_p1  ;;  %p544_p4 = scmp.lt.s32.totalorder %s542_s3, %s535_s20 }
  0x2a   : > { %p539_p11 = pneg %p538_p2  ;;  %p545_p5 = por %p544_p4, %p543_p9 }
  0x2c   : > { %p546_p6 = pnand %p545_p5, %p539_p11 }
  0x2e   : > { %549 = shalt.err (!%p546_p6)
}
  0x2f   : > { %s669_s7 = smov 384   ;;  %s670_s8 = smov 128  }
  0x30   : > { %s671_s15 = smov 8   ;;  %p441_p9 = scmp.ge.s32.totalorder %s666_s14, 1 }
  0x31   : > { %456 = dma.hbm_to_vmem [thread:$0]  (!%p771_p13), %s763_s30, 256, %s767_s4, %s134_s6, %s669_s7, %s670_s8, %s671_s15  }
  0x32   : > { %p177_p11 = scmp.lt.s32.totalorder %s666_s14, 4  ;;  %s817_s20 = scalar_lea.hbm %s922_s1, %s438_s27 }
  0x33   : > { %s160_s28 = scalar_lea.vmem [#allocation10], %s437_s26  ;;  %s157_s30 = scalar_lea.sflag [#allocation11], %s754_s25 }
  0x34   : > { %p808_p3 = pnand %p441_p9, %p177_p11  ;;  %s169_s29 = sshll.u32 %s160_s28, 4  ;;  %s821_s29 = int_to_ptr.vmem [resolvable:$true] %s169_s29 }
  0x35   : > { %s550_s4 = scalar_lea.hbm %s817_s20, 256  ;;  %s555_s27 = scalar_lea.hbm %s922_s1, 768 }
  0x36   : > { %p551_p7 = scmp.ne.s32.totalorder %s817_s20, %s550_s4  ;;  %p556_p0 = scmp.lt.u32.totalorder %s817_s20, %s922_s1 }
  0x37   : > { %p557_p2 = scmp.lt.u32.totalorder %s555_s27, %s550_s4  ;;  %p559_p5 = scmp.lt.u32.totalorder %s550_s4, %s817_s20 }
  0x38   : > { %p553_p10 = pnand %p551_p7, %p522_p1 }
  0x39   : > { %p558_p4 = por %p557_p2, %p556_p0 }
  0x3a   : > { %p554_p12 = pneg %p553_p10 }
  0x3b   : > { %p560_p6 = por %p559_p5, %p558_p4 }
  0x3d   : > { %p561_p9 = pnand %p560_p6, %p554_p12 }
  0x3f   : > { %564 = shalt.err (!%p561_p9)
}
  0x40   : > { %s565_s26 = scalar_lea.vmem %s821_s29, 256  ;;  %s672_s28 = smov [#allocation10]  }
  0x41   : > { %p566_p11 = scmp.ne.s32.totalorder %s821_s29, %s565_s26  ;;  %s570_s6 = sshll.u32 %s672_s28, 4  ;;  %s571_s6 = int_to_ptr.vmem [resolvable:$false] %s570_s6 }
  0x42   : > { %s572_s3 = scalar_lea.vmem %s571_s6, 512  ;;  %p573_p8 = scmp.lt.s32.totalorder %s821_s29, %s571_s6 }
  0x43   : > { %p568_p7 = pnand %p566_p11, %p522_p1  ;;  %p574_p0 = scmp.lt.s32.totalorder %s572_s3, %s565_s26 }
  0x45   : > { %p569_p10 = pneg %p568_p7  ;;  %p575_p2 = por %p574_p0, %p573_p8 }
  0x47   : > { %p576_p4 = pnand %p575_p2, %p569_p10 }
  0x49   : > { %579 = shalt.err (!%p576_p4)
}
  0x4a   : > { %459 = dma.hbm_to_vmem [thread:$0]  (!%p771_p13), %s817_s20, 256, %s821_s29, %s157_s30, %s669_s7, %s670_s8, %s671_s15  }
  0x4b   : > { %181 = sbr.rel (%p808_p3) target bundleno = 150 (0x96), region = 28  ;;  %s855_s4 = sand.u32 (!%p808_p3), 1, %s650_s10  }
  0x4c   : > { %s442_s27 = sshll.u32 (!%p808_p3), %s855_s4, 4  ;;  %s184_s18 = scalar_lea.sflag (!%p808_p3), [#allocation8], %s855_s4 }
  0x4d   : > { %s187_s5 = scalar_lea.vmem (!%p808_p3), [#allocation7], %s442_s27  ;;  %p932_p8 = scmp.ne.s32.totalorder (!%p808_p3), %s927_s21, 0 }
  0x52   : > { %633 = dma.done.wait (%p932_p8), %s184_s18, 256  }
  0x53   : > { %635 = vsyncadd (%p932_p8), %s184_s18, 4294967040  ;;  %s193_s25 = scalar_lea.sflag [#allocation11], %s855_s4  ;;  %s196_s7 = scalar_lea.vmem [#allocation10], %s442_s27 }
  0x54   : > { %637 = dma.done.wait (%p932_p8), %s193_s25, 256  }
  0x55   : > { %639 = vsyncadd (%p932_p8), %s193_s25, 4294967040  ;;  %v673_v0 = vmov 0.0   ;;  %v232_v1 = vld [vmem:[%s187_s5] sm:$0xff]  ;;  %v233_v2 = vld [vmem:[%s187_s5 + $0x8] sm:$0xff]  ;;  %s220_s21 = scalar_lea.vmem [#allocation12], %s855_s4  ;;  %s444_s15 = sshll.u32 %s658_s12, 4 }
  0x56   : > { %227 = vst [vmem:[#allocation2] sm:$0x1] %v673_v0  ;;  %228 = vst [vmem:[#allocation3] sm:$0x1] %v673_v0  ;;  %v234_v3 = vld [vmem:[%s196_s7] sm:$0xff]  ;;  %v237_v4 = vadd.f32 %v233_v2, %v232_v1  ;;  %v235_v5 = vld [vmem:[%s196_s7 + $0x8] sm:$0xff]  ;;  %v257_v6 = vmul.f32 %v232_v1, %v232_v1  ;;  %v258_v7 = vmul.f32 %v233_v2, %v233_v2  ;;  %s875_s29 = scalar_lea.hbm %s923_s2, %s444_s15 }
  0x57   : > { %229 = vst [vmem:[#allocation4] sm:$0x1] %v673_v0  ;;  %230 = vst [vmem:[#allocation5] sm:$0x1] %v673_v0  ;;  %v269_v8 = vmul.f32 %v234_v3, %v234_v3  ;;  %v247_v9 = vadd.f32 %v235_v5, %v234_v3  ;;  %v270_v10 = vmul.f32 %v235_v5, %v235_v5  ;;  %s332_s8 = sshll.u32 %s220_s21, 4  ;;  %s320_s30 = scalar_lea.sflag [#allocation9], %s855_s4  ;;  %s870_s8 = int_to_ptr.vmem [resolvable:$true] %s332_s8 }
  0x58   : > { %231 = vst [vmem:[#allocation6] sm:$0x1] %v673_v0  ;;  %v281_v11 = vmul.f32 %v234_v3, %v232_v1  ;;  %v282_v12 = vmul.f32 %v235_v5, %v233_v2  ;;  %v238_v13 = vrot.slane %v237_v4, 4  ;;  %v259_v14 = vadd.f32 %v258_v7, %v257_v6  ;;  %s580_s19 = scalar_lea.vmem %s870_s8, 16  ;;  %p933_p1 = scmp.ne.s32.totalorder %s928_s22, 0 }
  0x59   : > { %v248_v15 = vrot.slane %v247_v9, 4  ;;  %v271_v16 = vadd.f32 %v270_v10, %v269_v8  ;;  %p581_p13 = scmp.ne.s32.totalorder %s870_s8, %s580_s19  ;;  %s674_s12 = smov [#allocation12]  }
  0x5a   : > { %v283_v17 = vadd.f32 %v282_v12, %v281_v11  ;;  %v239_v18 = vadd.f32 %v238_v13, %v237_v4  ;;  %v260_v19 = vrot.slane %v259_v14, 4  ;;  %s584_s26 = sshll.u32 %s674_s12, 4  ;;  %s585_s26 = int_to_ptr.vmem [resolvable:$false] %s584_s26 }
  0x5b   : > { %v249_v20 = vadd.f32 %v248_v15, %v247_v9  ;;  %v272_v21 = vrot.slane %v271_v16, 4  ;;  %p582_p3 = pnand %p581_p13, %p933_p1  ;;  %s586_s28 = scalar_lea.vmem %s585_s26, 32 }
  0x5c   : > { %v284_v22 = vrot.slane %v283_v17, 4  ;;  %v240_v23 = vrot.slane %v239_v18, 2  ;;  %v261_v24 = vadd.f32 %v260_v19, %v259_v14  ;;  %p587_p5 = scmp.lt.s32.totalorder %s870_s8, %s585_s26  ;;  %p588_p6 = scmp.lt.s32.totalorder %s586_s28, %s580_s19 }
  0x5d   : > { %v250_v25 = vrot.slane %v249_v20, 2  ;;  %v273_v26 = vadd.f32 %v272_v21, %v271_v16  ;;  %v236_v35 = vld [vmem:[#allocation2] sm:$0x1]  ;;  %v246_v40 = vld [vmem:[#allocation3] sm:$0x1]  ;;  %p583_p12 = pneg %p582_p3 }
  0x5e   : > { %v285_v27 = vadd.f32 %v284_v22, %v283_v17  ;;  %v241_v28 = vadd.f32 %v240_v23, %v239_v18  ;;  %v262_v29 = vrot.slane %v261_v24, 2  ;;  %v256_v43 = vld [vmem:[#allocation4] sm:$0x1]  ;;  %v268_v48 = vld [vmem:[#allocation5] sm:$0x1]  ;;  %p589_p9 = por %p588_p6, %p587_p5 }
  0x5f   : > { %v251_v30 = vadd.f32 %v250_v25, %v249_v20  ;;  %v274_v31 = vrot.slane %v273_v26, 2  ;;  %v280_v49 = vld [vmem:[#allocation6] sm:$0x1] }
  0x60   : > { %v286_v32 = vrot.slane %v285_v27, 2  ;;  %v242_v33 = vrot.slane %v241_v28, 1  ;;  %v263_v34 = vadd.f32 %v262_v29, %v261_v24  ;;  %p590_p11 = pnand %p589_p9, %p583_p12 }
  0x61   : > { %v252_v36 = vrot.slane %v251_v30, 1  ;;  %v275_v37 = vadd.f32 %v274_v31, %v273_v26 }
  0x62   : > { %v287_v38 = vadd.f32 %v286_v32, %v285_v27  ;;  %v243_v39 = vadd.f32 %v242_v33, %v241_v28  ;;  %v264_v41 = vrot.slane %v263_v34, 1 }
  0x63   : > { %v253_v42 = vadd.f32 %v252_v36, %v251_v30  ;;  %v276_v44 = vrot.slane %v275_v37, 1 }
  0x64   : > { %v288_v45 = vrot.slane %v287_v38, 1  ;;  %v244_v46 = vadd.f32 %v243_v39, %v236_v35  ;;  %v265_v47 = vadd.f32 %v264_v41, %v263_v34 }
  0x65   : > { %v254_v50 = vadd.f32 %v253_v42, %v246_v40  ;;  %v277_v51 = vadd.f32 %v276_v44, %v275_v37 }
  0x66   : > { %v289_v52 = vadd.f32 %v288_v45, %v287_v38  ;;  %245 = vst [vmem:[#allocation2] sm:$0x1] %v244_v46  ;;  %v266_v53 = vadd.f32 %v265_v47, %v256_v43 }
  0x67   : > { %255 = vst [vmem:[#allocation3] sm:$0x1] %v254_v50  ;;  %v278_v54 = vadd.f32 %v277_v51, %v268_v48 }
  0x68   : > { %v290_v55 = vadd.f32 %v289_v52, %v280_v49  ;;  %267 = vst [vmem:[#allocation4] sm:$0x1] %v266_v53 }
  0x69   : > { %279 = vst [vmem:[#allocation5] sm:$0x1] %v278_v54 }
  0x6a   : > { %291 = vst [vmem:[#allocation6] sm:$0x1] %v290_v55 }
  0x6d   : > { %v295_v56 = vld [vmem:[#allocation2] sm:$0x1] }
  0x6e   : > { %v296_v57 = vmul.f32 0.1, %v295_v56  ;;  %v297_v58 = vld [vmem:[#allocation3] sm:$0x1] }
  0x6f   : > { %v298_v59 = vmul.f32 0.1, %v297_v58  ;;  %v299_v60 = vld [vmem:[#allocation4] sm:$0x1] }
  0x70   : > { %v300_v61 = vmul.f32 0.1, %v299_v60  ;;  %v301_v62 = vmul.f32 %v296_v57, %v296_v57  ;;  %v304_v63 = vld [vmem:[#allocation5] sm:$0x1] }
  0x71   : > { %v305_v0 = vmul.f32 0.1, %v304_v63  ;;  %v306_v1 = vmul.f32 %v298_v59, %v298_v59  ;;  %v309_v9 = vld [vmem:[#allocation6] sm:$0x1]  ;;  %v311_v11 = vmul.f32 %v298_v59, %v296_v57 }
  0x72   : > { %v302_v2 = vsub.f32 %v300_v61, %v301_v62  ;;  %v310_v10 = vmul.f32 0.1, %v309_v9 }
  0x73   : > { %v307_v3 = vsub.f32 %v305_v0, %v306_v1 }
  0x74   : > { %v303_v4 = vmax.f32 %v302_v2, 0.0  ;;  %v312_v12 = vsub.f32 %v310_v10, %v311_v11 }
  0x75   : > { %v308_v5 = vmax.f32 %v307_v3, 0.0 }
  0x76   : > { %v313_v6 = vadd.f32 1e-12, %v303_v4 }
  0x77   : > { %v314_v7 = vadd.f32 1e-12, %v308_v5 }
  0x79   : > { %v315_v8 = vmul.f32 %v314_v7, %v313_v6 }
  0x7b   : > { %518 = vrsqrt.f32 %v315_v8 }
  0x85   : > { %v519_v13 = vpop.eup %518 }
  0x86   : > { %v317_v14 = vmul.f32 %v519_v13, %v312_v12 }
  0x88   : > { %318 = vst [vmem:[%s220_s21] sm:$0x1] %v317_v14 }
  0x89   : > { %593 = shalt.err (!%p590_p11)
}
  0x8a   : > { %s594_s6 = scalar_lea.hbm %s875_s29, 16  ;;  %s598_s27 = scalar_lea.hbm %s923_s2, 48 }
  0x8b   : > { %p595_p7 = scmp.ne.s32.totalorder %s875_s29, %s594_s6  ;;  %p599_p2 = scmp.lt.u32.totalorder %s875_s29, %s923_s2 }
  0x8c   : > { %p600_p4 = scmp.lt.u32.totalorder %s598_s27, %s594_s6  ;;  %p602_p13 = scmp.lt.u32.totalorder %s594_s6, %s875_s29 }
  0x8d   : > { %p596_p10 = pnand %p595_p7, %p933_p1 }
  0x8e   : > { %p601_p8 = por %p600_p4, %p599_p2 }
  0x8f   : > { %p597_p0 = pneg %p596_p10 }
  0x90   : > { %p603_p3 = por %p602_p13, %p601_p8 }
  0x92   : > { %p604_p12 = pnand %p603_p3, %p597_p0 }
  0x94   : > { %607 = shalt.err (!%p604_p12)
}
  0x95   : > { %451 = dma.vmem_to_hbm [thread:$0]  (%p933_p1), %s870_s8, 16, %s875_s29, %s320_s30  }
  0x96 PF: > { %p465_p5 = scmp.ge.s32.totalorder %s666_s14, 2  ;;  %s344_s25 = sand.u32 1, %s646_s9  }
  0x97   : > { %p934_p6 = scmp.ne.s32.totalorder %s929_s24, 0  ;;  %s345_s7 = scalar_lea.sflag [#allocation9], %s344_s25 }
  0x99   : > { %p461_p9 = pnand %p465_p5, %p934_p6 }
  0x9b   : > { %641 = dma.done.wait (!%p461_p9), %s345_s7, 16  }
  0x9c   : > { %643 = vsyncadd (!%p461_p9), %s345_s7, 4294967280  ;;  %s21_s14 = sadd.s32 1, %s666_s14   ;;  %s935_s9 = smov %s650_s10 }
  0x9d   : > { %p18_p11 = scmp.ge.s32.totalorder %s21_s14, 5   ;;  %s936_s10 = smov %s654_s11 }
  0x9e   : > { %s937_s11 = smov %s746_s23  ;;  %s938_s12 = smov %s662_s13 }
  0x9f   : > { %s939_s13 = smov %s941_s17  ;;  %20 = sbr.rel (!%p18_p11) target bundleno = 8 (0x8), region = 94 }
  0xa6   :  { %349 = vsyncpa [#allocation8], 1 }
  0xa7   :  { %351 = vsyncpa [#allocation8 + $0x1], 1 }
  0xa8   :  { %352 = vsyncpa [#allocation11], 1 }
  0xa9   :  { %354 = vsyncpa [#allocation11 + $0x1], 1 }
  0xaa   :  { %355 = vsyncpa [#allocation9], 1 }
  0xab   :  { %357 = vsyncpa [#allocation9 + $0x1], 1 }

</bundles_post_ra>
